<compile_context>
chip_gen: v5e
topology: v5e:2x2
jax: 0.10.0
libtpu: 0.0.40
codegen_flags: <defaults>
</compile_context>

<pallas_src>
import functools
import math

import jax
import jax.numpy as jnp
from jax.experimental import pallas as pl
from jax.experimental.pallas import tpu as pltpu

_LANE = 128


def _round_up(n, m):
    return (n + m - 1) // m * m


def vae_kernel(x_ref, wf_ref, bf_ref, w2_ref, b2_ref, eps_ref,
               z_ref, mu_ref, lv_ref, *, data_dim):
    x = x_ref[...]                                                       # (TB, D) f32

    # Single fused MXU pass: x @ [W_mu^T | W1^T] + [b_mu | b1]  -> (TB, 2D)
    pre = jnp.dot(x, wf_ref[...].astype(jnp.float32),
                  preferred_element_type=jnp.float32) + bf_ref[...]
    mu = pre[:, :data_dim]                                               # (TB, D)
    h = jax.nn.sigmoid(pre[:, data_dim:])                                # (TB, D)  (EUP)

    # N=1 "matmul" on VPU + XLU: elementwise mul with the (1, D) w2 row, lane-reduce.
    logvar = jnp.sum(h * w2_ref[...], axis=-1, keepdims=True) + b2_ref[0, 0]   # (TB, 1)

    z = mu + eps_ref[...] * jnp.exp(0.5 * logvar)                        # broadcast over D

    z_ref[...] = z
    mu_ref[...] = mu
    # Lane-dense store: broadcast the per-row scalar across the 128-lane slab
    # (avoids masked vst.msk of a width-1 output); wrapper slices [:, :1].
    lv_ref[...] = jnp.broadcast_to(logvar, lv_ref.shape)


def vae_layer(x, params, eps, *, tile_b=256):
    """x, eps: (B, D) f32. params: packed weights from init_params(). Returns (z, mu, logvar)."""
    B, D = x.shape
    wf = params["wf_t"]      # (D, 2D) = [W_mu^T | W1^T]
    bf = params["bf"]        # (1, 2D) = [b_mu | b1]
    w2 = params["w2_row"]    # (1, D)
    b2 = params["b2"]        # (1, 1)  -> SMEM

    # Batch tile: multiple of 8 sublanes, no larger than (padded) B.
    tile_b = _round_up(max(1, min(tile_b, B)), 8)
    Bp = _round_up(B, tile_b)
    if Bp != B:
        pad = Bp - B
        x = jnp.pad(x, ((0, pad), (0, 0)))
        eps = jnp.pad(eps, ((0, pad), (0, 0)))
    grid = (Bp // tile_b,)

    # VMEM budget: double-buffered batch tiles (x, eps, z, mu, lv) + resident weights.
    elt = 4  # f32 bytes
    tile_bytes = 2 * (4 * tile_b * D + tile_b * _LANE) * elt
    weight_bytes = wf.size * wf.dtype.itemsize + (bf.size + w2.size) * elt
    vmem_bytes = int(min(max(2 * (tile_bytes + weight_bytes), 32 << 20), 48 << 20))

    batch_map = lambda i: (i, 0)
    const_map = lambda i: (0, 0)   # weights: same block every grid step -> stays resident

    z, mu, lv_pad = pl.pallas_call(
        functools.partial(vae_kernel, data_dim=D),
        out_shape=(
            jax.ShapeDtypeStruct((Bp, D), jnp.float32),       # z
            jax.ShapeDtypeStruct((Bp, D), jnp.float32),       # mu
            jax.ShapeDtypeStruct((Bp, _LANE), jnp.float32),   # logvar (lane-padded)
        ),
        grid_spec=pltpu.PrefetchScalarGridSpec(
            num_scalar_prefetch=0,
            grid=grid,
            in_specs=[
                pl.BlockSpec((tile_b, D), batch_map),                # x
                pl.BlockSpec((D, 2 * D), const_map),                 # fused weight (resident)
                pl.BlockSpec((1, 2 * D), const_map),                 # fused bias
                pl.BlockSpec((1, D), const_map),                     # w2 row
                pl.BlockSpec(memory_space=pltpu.MemorySpace.SMEM),   # b2 scalar
                pl.BlockSpec((tile_b, D), batch_map),                # eps
            ],
            out_specs=(
                pl.BlockSpec((tile_b, D), batch_map),
                pl.BlockSpec((tile_b, D), batch_map),
                pl.BlockSpec((tile_b, _LANE), batch_map),
            ),
        ),
        compiler_params=pltpu.CompilerParams(
            dimension_semantics=("parallel",),    # independent batch tiles -> megacore on v7x
            vmem_limit_bytes=vmem_bytes,
        ),
    )(x, wf, bf, w2, b2, eps)

    return z[:B], mu[:B], lv_pad[:B, :1]


def init_params(key, D, *, weight_dtype=jnp.float32):
    """Deterministic init mirroring the PyTorch module's __init__ (packed for the kernel).

    For production on v6e/v7x pass weight_dtype=jnp.bfloat16 to halve weight DMA/VMEM
    (the kernel keeps f32 accumulation and f32 elementwise math).
    """
    k_bmu, k_w1, k_b1, k_w2 = jax.random.split(key, 4)
    bound = 1.0 / math.sqrt(D)

    # VariationalMean: Linear(D, D); weight overridden to identity, default bias init.
    wmu = jnp.eye(D, dtype=jnp.float32)
    bmu = jax.random.uniform(k_bmu, (1, D), jnp.float32, -bound, bound)

    # VariationalVar: Linear(D, D) (normal(0, 1/sqrt(D))), Sigmoid, Linear(D, 1), bias = -2.
    w1 = bound * jax.random.normal(k_w1, (D, D), jnp.float32)
    b1 = jax.random.uniform(k_b1, (1, D), jnp.float32, -bound, bound)
    w2 = bound * jax.random.normal(k_w2, (1, D), jnp.float32)
    b2 = jnp.full((1, 1), -2.0, dtype=jnp.float32)

    return {
        # packed kernel operands
        "wf_t": jnp.concatenate([wmu.T, w1.T], axis=1).astype(weight_dtype),  # (D, 2D)
        "bf": jnp.concatenate([bmu, b1], axis=1),                             # (1, 2D)
        "w2_row": w2,                                                         # (1, D)
        "b2": b2,                                                             # (1, 1)
        # unpacked copies (reference check only)
        "wmu_t": wmu.T, "bmu": bmu, "w1_t": w1.T, "b1": b1, "w2_t": w2.T,
    }


if __name__ == "__main__":
    # Small demo shapes (B intentionally not a tile multiple to exercise padding;
    # tile_b=8 gives a 2-step batch grid).
    B, D = 10, 32
    key = jax.random.PRNGKey(0)
    k_x, k_params, k_eps = jax.random.split(key, 3)

    x = jax.random.normal(k_x, (B, D), jnp.float32)
    params = init_params(k_params, D)
    # eps generated outside the kernel for determinism (torch.randn_like equivalent).
    eps = jax.random.normal(k_eps, (B, D), jnp.float32)

    z, mu, logvar = vae_layer(x, params, eps, tile_b=8)
    jax.block_until_ready((z, mu, logvar))

    # Pure-JAX reference check (unfused weights).
    mu_ref = x @ params["wmu_t"] + params["bmu"]
    h_ref = jax.nn.sigmoid(x @ params["w1_t"] + params["b1"])
    lv_ref = h_ref @ params["w2_t"] + params["b2"]
    z_ref = mu_ref + eps * jnp.exp(0.5 * lv_ref)
    assert jnp.allclose(mu, mu_ref, atol=1e-5)
    assert jnp.allclose(logvar, lv_ref, atol=1e-5)
    assert jnp.allclose(z, z_ref, atol=1e-5)

    print("KERNEL_OK")
</pallas_src>

<mosaic_0001>
module attributes {stable_mosaic.version = 11 : i64} {
  func.func @vae_kernel(%arg0: i32, %arg1: memref<8x32xf32, #tpu.memory_space<vmem>>, %arg2: memref<32x64xf32, #tpu.memory_space<vmem>>, %arg3: memref<1x64xf32, #tpu.memory_space<vmem>>, %arg4: memref<1x32xf32, #tpu.memory_space<vmem>>, %arg5: memref<1x1xf32, #tpu.memory_space<smem>>, %arg6: memref<8x32xf32, #tpu.memory_space<vmem>>, %arg7: memref<8x32xf32, #tpu.memory_space<vmem>>, %arg8: memref<8x32xf32, #tpu.memory_space<vmem>>, %arg9: memref<8x128xf32, #tpu.memory_space<vmem>>) attributes {dimension_semantics = [#tpu.dimension_semantics<parallel>], iteration_bounds = array<i64: 2>, scalar_prefetch = 0 : i64, scratch_operands = 0 : i64, tpu.core_type = #tpu.core_type<tc>, window_params = [{transform_indices = @transform_0, window_bounds = array<i64: 8, 32>}, {pipeline_mode = #tpu.pipeline_mode<synchronous>, transform_indices = @transform_1, window_bounds = array<i64: 32, 64>}, {pipeline_mode = #tpu.pipeline_mode<synchronous>, transform_indices = @transform_2, window_bounds = array<i64: 1, 64>}, {pipeline_mode = #tpu.pipeline_mode<synchronous>, transform_indices = @transform_3, window_bounds = array<i64: 1, 32>}, {transform_indices = @transform_4, window_bounds = array<i64: 1, 1>}, {transform_indices = @transform_5, window_bounds = array<i64: 8, 32>}, {transform_indices = @transform_6, window_bounds = array<i64: 8, 32>}, {transform_indices = @transform_7, window_bounds = array<i64: 8, 32>}, {transform_indices = @transform_8, window_bounds = array<i64: 8, 128>}]} {
    %c0 = arith.constant 0 : index
    %c0_0 = arith.constant 0 : index
    %0 = vector.load %arg1[%c0, %c0_0] : memref<8x32xf32, #tpu.memory_space<vmem>>, vector<8x32xf32>
    %c0_1 = arith.constant 0 : index
    %c0_2 = arith.constant 0 : index
    %1 = vector.load %arg2[%c0_1, %c0_2] : memref<32x64xf32, #tpu.memory_space<vmem>>, vector<32x64xf32>
    %cst = arith.constant dense<0.000000e+00> : vector<8x64xf32>
    %2 = tpu.matmul %0, %1, %cst {dimension_numbers = #tpu.dot_dimension_numbers<[1], [0], [0], [1], [0, 0, 1, 1], [], []>} : vector<8x32xf32>, vector<32x64xf32>, vector<8x64xf32> -> vector<8x64xf32>
    %c0_3 = arith.constant 0 : index
    %c0_4 = arith.constant 0 : index
    %3 = vector.load %arg3[%c0_3, %c0_4] : memref<1x64xf32, #tpu.memory_space<vmem>>, vector<1x64xf32>
    %4 = vector.broadcast %3 : vector<1x64xf32> to vector<8x64xf32>
    %5 = arith.addf %2, %4 : vector<8x64xf32>
    %6 = vector.extract_strided_slice %5 {offsets = [0, 0], sizes = [8, 32], strides = [1, 1]} : vector<8x64xf32> to vector<8x32xf32>
    %7 = vector.extract_strided_slice %5 {offsets = [0, 32], sizes = [8, 32], strides = [1, 1]} : vector<8x64xf32> to vector<8x32xf32>
    %8 = arith.negf %7 : vector<8x32xf32>
    %9 = math.exp %8 : vector<8x32xf32>
    %cst_5 = arith.constant 1.000000e+00 : f32
    %10 = vector.broadcast %cst_5 : f32 to vector<8x32xf32>
    %11 = arith.addf %10, %9 : vector<8x32xf32>
    %12 = arith.divf %10, %11 : vector<8x32xf32>
    %c0_6 = arith.constant 0 : index
    %c0_7 = arith.constant 0 : index
    %13 = vector.load %arg4[%c0_6, %c0_7] : memref<1x32xf32, #tpu.memory_space<vmem>>, vector<1x32xf32>
    %14 = vector.broadcast %13 : vector<1x32xf32> to vector<8x32xf32>
    %15 = arith.mulf %12, %14 : vector<8x32xf32>
    %cst_8 = arith.constant dense<0.000000e+00> : vector<8xf32>
    %16 = vector.multi_reduction <add>, %15, %cst_8 [1] : vector<8x32xf32> to vector<8xf32>
    %17 = vector.shape_cast %16 : vector<8xf32> to vector<8x1xf32>
    %c0_9 = arith.constant 0 : index
    %c0_10 = arith.constant 0 : index
    %18 = memref.load %arg5[%c0_9, %c0_10] : memref<1x1xf32, #tpu.memory_space<smem>>
    %19 = vector.broadcast %18 : f32 to vector<8x1xf32>
    %20 = arith.addf %17, %19 : vector<8x1xf32>
    %c0_11 = arith.constant 0 : index
    %c0_12 = arith.constant 0 : index
    %21 = vector.load %arg6[%c0_11, %c0_12] : memref<8x32xf32, #tpu.memory_space<vmem>>, vector<8x32xf32>
    %cst_13 = arith.constant 5.000000e-01 : f32
    %22 = vector.broadcast %cst_13 : f32 to vector<8x1xf32>
    %23 = arith.mulf %22, %20 : vector<8x1xf32>
    %24 = math.exp %23 : vector<8x1xf32>
    %25 = vector.broadcast %24 : vector<8x1xf32> to vector<8x32xf32>
    %26 = arith.mulf %21, %25 : vector<8x32xf32>
    %27 = arith.addf %6, %26 : vector<8x32xf32>
    %c0_14 = arith.constant 0 : index
    %c0_15 = arith.constant 0 : index
    %28 = vector.load %arg7[%c0_14, %c0_15] : memref<8x32xf32, #tpu.memory_space<vmem>>, vector<8x32xf32>
    tpu.vector_store %arg7[%c0_14, %c0_15], %27 {strides = array<i32>} : memref<8x32xf32, #tpu.memory_space<vmem>>, vector<8x32xf32>,
    %c0_16 = arith.constant 0 : index
    %c0_17 = arith.constant 0 : index
    %29 = vector.load %arg8[%c0_16, %c0_17] : memref<8x32xf32, #tpu.memory_space<vmem>>, vector<8x32xf32>
    tpu.vector_store %arg8[%c0_16, %c0_17], %6 {strides = array<i32>} : memref<8x32xf32, #tpu.memory_space<vmem>>, vector<8x32xf32>,
    %30 = vector.shape_cast %20 : vector<8x1xf32> to vector<8x1xf32>
    %31 = vector.broadcast %30 : vector<8x1xf32> to vector<8x128xf32>
    %c0_18 = arith.constant 0 : index
    %c0_19 = arith.constant 0 : index
    %32 = vector.load %arg9[%c0_18, %c0_19] : memref<8x128xf32, #tpu.memory_space<vmem>>, vector<8x128xf32>
    tpu.vector_store %arg9[%c0_18, %c0_19], %31 {strides = array<i32>} : memref<8x128xf32, #tpu.memory_space<vmem>>, vector<8x128xf32>,
    return
  }
  func.func @transform_0(%arg0: i32) -> (i32, i32) {
    %c0_i32 = arith.constant 0 : i32
    %c0_i32_0 = arith.constant 0 : i32
    return %arg0, %c0_i32 : i32, i32
  }
  func.func @transform_1(%arg0: i32) -> (i32, i32) {
    %c0_i32 = arith.constant 0 : i32
    %c0_i32_0 = arith.constant 0 : i32
    %c0_i32_1 = arith.constant 0 : i32
    return %c0_i32, %c0_i32_0 : i32, i32
  }
  func.func @transform_2(%arg0: i32) -> (i32, i32) {
    %c0_i32 = arith.constant 0 : i32
    %c0_i32_0 = arith.constant 0 : i32
    %c0_i32_1 = arith.constant 0 : i32
    return %c0_i32, %c0_i32_0 : i32, i32
  }
  func.func @transform_3(%arg0: i32) -> (i32, i32) {
    %c0_i32 = arith.constant 0 : i32
    %c0_i32_0 = arith.constant 0 : i32
    %c0_i32_1 = arith.constant 0 : i32
    return %c0_i32, %c0_i32_0 : i32, i32
  }
  func.func @transform_4(%arg0: i32) -> (i32, i32) {
    %c0_i32 = arith.constant 0 : i32
    %c0_i32_0 = arith.constant 0 : i32
    %c0_i32_1 = arith.constant 0 : i32
    return %c0_i32, %c0_i32_0 : i32, i32
  }
  func.func @transform_5(%arg0: i32) -> (i32, i32) {
    %c0_i32 = arith.constant 0 : i32
    %c0_i32_0 = arith.constant 0 : i32
    return %arg0, %c0_i32 : i32, i32
  }
  func.func @transform_6(%arg0: i32) -> (i32, i32) {
    %c0_i32 = arith.constant 0 : i32
    %c0_i32_0 = arith.constant 0 : i32
    return %arg0, %c0_i32 : i32, i32
  }
  func.func @transform_7(%arg0: i32) -> (i32, i32) {
    %c0_i32 = arith.constant 0 : i32
    %c0_i32_0 = arith.constant 0 : i32
    return %arg0, %c0_i32 : i32, i32
  }
  func.func @transform_8(%arg0: i32) -> (i32, i32) {
    %c0_i32 = arith.constant 0 : i32
    %c0_i32_0 = arith.constant 0 : i32
    return %arg0, %c0_i32 : i32, i32
  }
}

</mosaic_0001>

<bundles_post_ra>
// kernel: tpu_custom_call.1
= control target key start
LH: loop header
LB: loop body
LE: loop exit
PB: predicated region body
PF: predicated region fallthrough
CT: control target
= control target key end

     0   :  { %s1329_s0 = inlined_call_operand.hbm [shape: f32[16,32], index: 0, kind: input, shape index: {}]   ;;  %s1330_s1 = inlined_call_operand.hbm [shape: f32[32,64], index: 1, kind: input, shape index: {}]   ;;  %s1331_s2 = inlined_call_operand.vmem [shape: f32[1,64], index: 2, kind: input, shape index: {}]   ;;  %s1332_s3 = inlined_call_operand.vmem [shape: f32[1,32], index: 3, kind: input, shape index: {}]   ;;  %s1333_s4 = inlined_call_operand.<no memory space> [shape: f32[1,1], index: 4, kind: input, shape index: {}]   ;;  %s1334_s5 = inlined_call_operand.hbm [shape: f32[16,32], index: 5, kind: input, shape index: {}]   ;;  %s1335_s6 = inlined_call_operand.hbm [shape: f32[16,32], index: 6, kind: output, shape index: {0}]   ;;  %s1336_s7 = inlined_call_operand.hbm [shape: f32[16,32], index: 7, kind: output, shape index: {1}]   ;;  %s1337_s8 = inlined_call_operand.hbm [shape: f32[16,128], index: 8, kind: output, shape index: {2}]  }
   0x1   :  { %1343 = sst [smem:[#allocation21_spill]] %s1329_s0 }
   0x2   :  { %1344 = sst [smem:[#allocation22_spill]] %s1330_s1 }
   0x3   :  { %14 = sst [smem:[#allocation2]] %s1333_s4 }
   0x4   :  { %15 = vsyncpa [#allocation4], 0 }
   0x5   :  { %17 = vsyncpa [#allocation4 + $0x1], 0 }
   0x6   :  { %18 = vsyncpa [#allocation7], 0 }
   0x7   :  { %19 = vsyncpa [#allocation5], 0 }
   0x8   :  { %21 = vsyncpa [#allocation5 + $0x1], 0 }
   0x9   :  { %22 = vsyncpa [#allocation11], 0 }
   0xa   :  { %24 = vsyncpa [#allocation11 + $0x1], 0  ;;  %s1078_s29 = smov 0   ;;  %s1080_s30 = smov 0  }
   0xb   :  { %s1082_s9 = smov 0   ;;  %s1084_s10 = smov 0  }
   0xc LB: > { %1345 = sst [smem:[#allocation18_spill]] %s1019_s9  ;;  %s1099_s4 = sadd.s32 4294967295, %s1023_s10   ;;  %s1023_s10 = sphi %s1084_s10, %s1360_s10   ;;  %s1019_s9 = sphi %s1082_s9, %s1362_s9   ;;  %s1015_s30 = sphi %s1080_s30, %s1364_s30   ;;  %s1011_s29 = sphi %s1078_s29, %s1363_s29  }
   0xd   : > { %s1338_s11 = sadd.s32 4294967294, %s1023_s10   ;;  %s1103_s12 = sadd.s32 1, %s1023_s10  }
   0xe   : > { %1346 = sst [smem:[#allocation19_spill]] %s1103_s12  ;;  %s37_s13 = sadd.s32 1, %s1019_s9 }
   0xf   : > { %s34_s14 = ssub.s32 %s1023_s10, %s1103_s12  ;;  %p44_p0 = scmp.ne.s32.totalorder %s1019_s9, %s1015_s30 }
  0x10   : > { %p35_p1 = scmp.eq.s32.totalorder %s34_s14, 0  ;;  %p45_p2 = scmp.eq.s32.totalorder %s1023_s10, 0 }
  0x11   : > { %p50_p3 = scmp.ne.s32.totalorder %s1015_s30, %s1011_s29  ;;  %p184_p4 = scmp.eq.s32.totalorder %s1099_s4, 1 }
  0x12   : > { %s1115_s15 = scalar_select %p35_p1, %s1019_s9, %s37_s13  }
  0x13   : > { %p1117_p5 = por %p184_p4, %p44_p0  ;;  %p190_p6 = scmp.eq.s32.totalorder %s1338_s11, 1 }
  0x14   : > { %1347 = sst [smem:[#allocation20_spill]] %s1115_s15  ;;  %p1123_p7 = por %p45_p2, %p44_p0 }
  0x15   : > { %p1131_p9 = por %p190_p6, %p50_p3  ;;  %p751_p10 = scmp.lt.s32.totalorder %s1023_s10, 2 }
  0x16   : > { %s285_s19 = sand.u32 1, %s1023_s10   ;;  %s287_s20 = sand.u32 1, %s1019_s9  }
  0x17   : > { %s1138_s21 = sshll.u32 %s287_s20, 3  ;;  %s695_s22 = sshll.u32 %s1023_s10, 3 }
  0x18   : > { %s1351_s0 = sld [smem:[#allocation21_spill]]  ;;  %s289_s27 = scalar_lea.vmem [#allocation3], %s1138_s21 }
  0x19   : > { %s297_s28 = sshll.u32 %s289_s27, 4  ;;  %p1147_p11 = pnand %p751_p10, %p1123_p7  ;;  %s298_s28 = int_to_ptr.vmem [resolvable:$true] %s297_s28 }
  0x1a   : > { %p1342_p12 = scmp.eq.s32.totalorder %s1099_s4, 0  ;;  %p691_p13 = scmp.ge.s32.totalorder %s1023_s10, 1 }
  0x1b   : > { %s1153_s14 = scalar_lea.sflag [#allocation4], %s285_s19  ;;  %p803_p1 = pneg %p1147_p11 }
  0x1e   : > { %s293_s25 = scalar_lea.hbm %s1351_s0, %s695_s22 }
  0x1f   : > { %s295_s26 = sshll.u32 %s293_s25, 4  ;;  %s806_s25 = scalar_lea.hbm %s1351_s0, 16  ;;  %s296_s26 = int_to_ptr.hbm [resolvable:$true] %s295_s26 }
  0x20   : > { %s799_s20 = sshra.s32 %s296_s26, 4  ;;  %s800_s20 = int_to_ptr.hbm [resolvable:$true] %s799_s20 }
  0x21   : > { %s801_s23 = scalar_lea.hbm %s800_s20, 8  ;;  %p807_p6 = scmp.lt.s32.totalorder %s800_s20, %s1351_s0 }
  0x22   : > { %p802_p0 = scmp.ne.s32.totalorder %s800_s20, %s801_s23  ;;  %p808_p7 = scmp.lt.s32.totalorder %s806_s25, %s801_s23 }
  0x24   : > { %p804_p2 = pnand %p803_p1, %p802_p0  ;;  %p809_p10 = por %p808_p7, %p807_p6 }
  0x26   : > { %p805_p4 = pneg %p804_p2 }
  0x28   : > { %p810_p8 = pnand %p809_p10, %p805_p4 }
  0x2a   : > { %813 = shalt.err (!%p810_p8)
}
  0x2b   : > { %736 = dma.hbm_to_vmem [thread:$0]  (!%p1147_p11), %s296_s26, 128, %s298_s28, %s1153_s14  }
  0x2c   : > { %p1174_p0 = por %p1342_p12, %p50_p3  ;;  %p249_p2 = scmp.lt.s32.totalorder %s1023_s10, 3 }
  0x2d   : > { %s1354_s1 = sld [smem:[#allocation22_spill]]  ;;  %s312_s25 = scalar_lea.hbm %s1334_s5, %s695_s22 }
  0x2e   : > { %p1187_p8 = pnand %p691_p13, %p249_p2  ;;  %s1025_s26 = smov [#allocation6]  }
  0x2f   : > { %s262_s28 = sshll.u32 %s1025_s26, 4  ;;  %s314_s0 = sshll.u32 %s312_s25, 4  ;;  %s263_s28 = int_to_ptr.vmem [resolvable:$true] %s262_s28  ;;  %s315_s0 = int_to_ptr.hbm [resolvable:$true] %s314_s0 }
  0x30   : > { %p729_p3 = pneg %p1187_p8  ;;  %s308_s19 = scalar_lea.vmem [#allocation8], %s1138_s21 }
  0x31   : > { %s316_s20 = sshll.u32 %s308_s19, 4  ;;  %s1026_s22 = smov 128   ;;  %s317_s20 = int_to_ptr.vmem [resolvable:$true] %s316_s20 }
  0x32   : > { %p730_p4 = pnand %p729_p3, %p1342_p12  ;;  %s1027_s17 = smov 8  }
  0x33   : > { %s260_s23 = sshll.u32 %s1354_s1, 4  ;;  %s859_s24 = sshra.s32 %s315_s0, 4  ;;  %s261_s23 = int_to_ptr.hbm [resolvable:$true] %s260_s23  ;;  %s860_s24 = int_to_ptr.hbm [resolvable:$true] %s859_s24 }
  0x34   : > { %732 = dma.hbm_to_vmem [thread:$0]  (!%p730_p4), %s261_s23, 512, %s263_s28, [#allocation7], %s1026_s22, %s1026_s22, %s1027_s17  }
  0x35   : > { %s861_s1 = scalar_lea.hbm %s860_s24, 8  ;;  %s866_s25 = scalar_lea.hbm %s1334_s5, 16 }
  0x36   : > { %p862_p13 = scmp.ne.s32.totalorder %s860_s24, %s861_s1  ;;  %p867_p10 = scmp.lt.s32.totalorder %s860_s24, %s1334_s5 }
  0x37   : > { %p868_p2 = scmp.lt.s32.totalorder %s866_s25, %s861_s1 }
  0x38   : > { %p864_p6 = pnand %p862_p13, %p803_p1 }
  0x39   : > { %p869_p3 = por %p868_p2, %p867_p10 }
  0x3a   : > { %p865_p7 = pneg %p864_p6 }
  0x3c   : > { %p870_p12 = pnand %p869_p3, %p865_p7 }
  0x3e   : > { %873 = shalt.err (!%p870_p12)
}
  0x3f   : > { %739 = dma.hbm_to_vmem [thread:$0]  (!%p1147_p11), %s315_s0, 128, %s317_s20, %s1153_s14  }
  0x40   : > { %325 = sbr.rel (%p1187_p8) target bundleno = 494 (0x1ee), region = 44  ;;  %s327_s15 = sand.u32 (!%p1187_p8), 1, %s1099_s4  }
  0x41   : > { %s329_s21 = sand.u32 (!%p1187_p8), 1, %s1015_s30   ;;  %s328_s1 = scalar_lea.sflag (!%p1187_p8), [#allocation4], %s327_s15 }
  0x42   : > { %s1214_s9 = sshll.u32 (!%p1187_p8), %s329_s21, 3 }
  0x43   : > { %s331_s12 = scalar_lea.vmem (!%p1187_p8), [#allocation3], %s1214_s9 }
  0x45   : > { %990 = dma.done.wait (%p1174_p0), %s328_s1, 128  }
  0x46   : > { %992 = vsyncadd (%p1174_p0), %s328_s1, 4294967168  ;;  %p1356_p11 = scmp.eq.s32.totalorder %s1099_s4, 0 }
  0x48   : > { %994 = dma.done.wait (%p1356_p11), [#allocation7], 512   ;;  %p1357_p12 = pmov %p1356_p11 }
  0x49   : > { %s346_s0 = scalar_lea.vmem [#allocation8], %s1214_s9 }
  0x4a   : > { %996 = vsyncadd (%p1357_p12), [#allocation7], 4294966784 }
  0x4b   : > { %998 = dma.done.wait (%p1174_p0), %s328_s1, 128  }
  0x4c   : > { %1000 = vsyncadd (%p1174_p0), %s328_s1, 4294967168  ;;  %v399_v0 = vld [vmem:[#allocation6 + $0x18] sm:$0xff]  ;;  %v398_v1 = vld [vmem:[#allocation6 + $0x10] sm:$0xff]  ;;  %s1028_s23 = smov 32   ;;  %vm404_vm0 = vcmask 261120   ;;  %s387_s28 = scalar_lea.vmem [#allocation10], %s1214_s9 }
  0x4d   : > { %420 = vmatpush.msra.mxu0 %v399_v0  ;;  %v397_v2 = vld [vmem:[#allocation6 + $0x8] sm:$0xff]  ;;  %v791_v3 = vld [vmem:[%s1332_s3] ss:$0 sm:$0xff]  ;;  %v396_v4 = vld [vmem:[#allocation6] sm:$0xff]  ;;  %s1029_s19 = smov 96   ;;  %s1249_s20 = sshll.u32 %s1099_s4, 3 }
  0x4e   : > { %450 = vrot.lane.b32.xlu0 %v791_v3, %s1028_s23  ;;  %v395_v5 = vld [vmem:[%s331_s12] sm:$0xff]  ;;  %s508_s24 = scalar_lea.hbm %s1336_s7, %s1249_s20  ;;  %s510_s26 = sshll.u32 %s387_s28, 4  ;;  %s511_s26 = int_to_ptr.vmem [resolvable:$true] %s510_s26 }
  0x4f   : > { %421 = vmatpush.msra.mxu0 %v398_v1  ;;  %v792_v6 = vld [vmem:[%s1331_s2] ss:$0 sm:$0xff]  ;;  %s512_s25 = sshll.u32 %s508_s24, 4  ;;  %s1259_s1 = scalar_lea.sflag [#allocation11], %s327_s15  ;;  %s513_s25 = int_to_ptr.hbm [resolvable:$true] %s512_s25 }
  0x50   : > { %s903_s12 = sshra.s32 %s513_s25, 4  ;;  %s909_s11 = scalar_lea.hbm %s1336_s7, 16  ;;  %s904_s12 = int_to_ptr.hbm [resolvable:$true] %s903_s12 }
  0x51   : > { %422 = vmatpush.msra.mxu0 %v397_v2  ;;  %s905_s13 = scalar_lea.hbm %s904_s12, 8  ;;  %p910_p4 = scmp.lt.s32.totalorder %s904_s12, %s1336_s7 }
  0x52   : > { %p906_p1 = scmp.ne.s32.totalorder %s904_s12, %s905_s13  ;;  %p911_p13 = scmp.lt.s32.totalorder %s909_s11, %s905_s13 }
  0x53   : > { %423 = vmatpush.msra.mxu0 %v396_v4 }
  0x54   : > { %705 = vmatmul.msk.f32.vlgmr.msra.gmra.mxu0 %vm404_vm0, %v395_v5  ;;  %p907_p0 = pnand %p906_p1, %p1117_p5  ;;  %p912_p6 = por %p911_p13, %p910_p4 }
  0x56   : > { %p908_p8 = pneg %p907_p0 }
  0x58   : > { %p913_p7 = pnand %p912_p6, %p908_p8 }
  0xc0   : > { %v451_v19 = vpop.permute.xlu0 %450 }
  0xd1   : > { %v425_v7 = vpop.f32.mrf.mxu0 }
  0xd2   : > { %v1239_v8 = vadd.f32 %v792_v6, %v425_v7 }
  0xd4   : > { %v706_v9 = vmul.f32 -1.442695, %v1239_v8  ;;  %471 = vst.msk [vmem:[%s387_s28] sm:$0xff] %vm404_vm0, %v1239_v8 }
  0xd6   : > { %793 = vpow2.f32 %v706_v9 }
  0xdc   : > { %v794_v10 = vpop.eup %793 }
  0xdd   : > { %v431_v11 = vadd.f32 1.0, %v794_v10 }
  0xdf   : > { %795 = vrcp.f32 %v431_v11  ;;  %v443_v15 = vand.u32 2147483648, %v431_v11  ;;  %v441_v17 = vand.u32 2147483647, %v431_v11  ;;  %vm437_vm2 = vweird.f32 %v431_v11 }
  0xe1   : > { %v444_v20 = vor.u32 1.1754944e-38, %v443_v15  ;;  %vm442_vm4 = vcmp.eq.f32.partialorder %v441_v17, 8.507059e+37 }
  0xe5   : > { %v796_v12 = vpop.eup %795 }
  0xe6   : > { %v433_v13 = vmul.f32 %v796_v12, %v431_v11  ;;  %vm438_vm1 = vweird.f32 %v796_v12 }
  0xe7   : > { %vm439_vm3 = vmor %vm437_vm2, %vm438_vm1 }
  0xe8   : > { %v434_v14 = vsub.f32 1.0, %v433_v13 }
  0xea   : > { %v435_v16 = vmul.f32 %v796_v12, %v434_v14 }
  0xec   : > { %v436_v18 = vadd.f32 %v796_v12, %v435_v16 }
  0xee   : > { %v440_v21 = vsel %vm439_vm3, %v796_v12, %v436_v18 }
  0xef   : > { %v445_v22 = vsel %vm442_vm4, %v444_v20, %v440_v21 }
  0xf0   : > { %v453_v23 = vmul.f32 %v451_v19, %v445_v22 }
  0xf2   : > { %455 = vrot.lane.b32.xlu0 %v453_v23, %s1029_s19 }
 0x164   : > { %v456_v24 = vpop.permute.xlu0 %455 }
 0x165   : > { %v458_v25 = vsel %vm404_vm0, %v456_v24, 0.0 }
 0x166   : > { %459 = vadd.xlane.f32.xlu1 %v458_v25 }
 0x167   : > { %916 = shalt.err (!%p913_p7)
}
 0x168   : > { %724 = dma.vmem_to_hbm [thread:$0]  (%p1117_p5), %s511_s26, 128, %s513_s25, %s1259_s1  }
 0x169   : > { %s461_s4 = sld [smem:[#allocation2]]  ;;  %s522_s22 = scalar_lea.hbm %s1337_s8, %s1249_s20 }
 0x16a   : > { %s394_s17 = scalar_lea.vmem [#allocation12], %s1214_s9  ;;  %s526_s12 = sshll.u32 %s522_s22, 4  ;;  %s527_s12 = int_to_ptr.hbm [resolvable:$true] %s526_s12 }
 0x16b   : > { %s524_s24 = sshll.u32 %s394_s17, 4  ;;  %s931_s13 = sshra.s32 %s527_s12, 4  ;;  %s525_s24 = int_to_ptr.vmem [resolvable:$true] %s524_s24  ;;  %s932_s13 = int_to_ptr.hbm [resolvable:$true] %s931_s13 }
 0x16c   : > { %s933_s14 = scalar_lea.hbm %s932_s13, 8  ;;  %s937_s23 = scalar_lea.hbm %s1337_s8, 16 }
 0x16d   : > { %p934_p10 = scmp.ne.s32.totalorder %s932_s13, %s933_s14  ;;  %p938_p11 = scmp.lt.s32.totalorder %s932_s13, %s1337_s8 }
 0x16e   : > { %p939_p12 = scmp.lt.s32.totalorder %s937_s23, %s933_s14 }
 0x16f   : > { %v462_v26 = vstv %s461_s4  ;;  %p935_p2 = pnand %p934_p10, %p1117_p5 }
 0x170   : > { %p940_p1 = por %p939_p12, %p938_p11 }
 0x171   : > { %p936_p3 = pneg %p935_p2 }
 0x173   : > { %p941_p0 = pnand %p940_p1, %p936_p3 }
 0x1d9   : > { %v460_v27 = vpop.xlane.xlu1 %459 }
 0x1da   : > { %v463_v28 = vadd.f32 %v462_v26, %v460_v27 }
 0x1dc   : > { %v465_v29 = vmul.f32 0.5, %v463_v28  ;;  %472 = vst [vmem:[%s394_s17] sm:$0xff] %v463_v28 }
 0x1dd   : > { %944 = shalt.err (!%p941_p0)
}
 0x1de   : > { %725 = dma.vmem_to_hbm [thread:$0]  (%p1117_p5), %s525_s24, 128, %s527_s12, %s1259_s1   ;;  %v466_v30 = vmul.f32 1.442695, %v465_v29  ;;  %v464_v31 = vld [vmem:[%s346_s0] sm:$0xff] }
 0x1df   : > { %s494_s15 = scalar_lea.hbm %s1335_s6, %s1249_s20  ;;  %s380_s28 = scalar_lea.vmem [#allocation9], %s1214_s9 }
 0x1e0   : > { %797 = vpow2.f32 %v466_v30  ;;  %s496_s22 = sshll.u32 %s380_s28, 4  ;;  %s498_s17 = sshll.u32 %s494_s15, 4  ;;  %s497_s22 = int_to_ptr.vmem [resolvable:$true] %s496_s22  ;;  %s499_s17 = int_to_ptr.hbm [resolvable:$true] %s498_s17 }
 0x1e1   : > { %s474_s1 = scalar_lea.sflag [#allocation5], %s329_s21  ;;  %s959_s24 = sshra.s32 %s499_s17, 4  ;;  %s960_s24 = int_to_ptr.hbm [resolvable:$true] %s959_s24 }
 0x1e2   : > { %s961_s12 = scalar_lea.hbm %s960_s24, 8  ;;  %s965_s20 = scalar_lea.hbm %s1335_s6, 16 }
 0x1e3   : > { %p962_p8 = scmp.ne.s32.totalorder %s960_s24, %s961_s12  ;;  %p966_p6 = scmp.lt.s32.totalorder %s960_s24, %s1335_s6 }
 0x1e4   : > { %p967_p7 = scmp.lt.s32.totalorder %s965_s20, %s961_s12 }
 0x1e5   : > { %p963_p4 = pnand %p962_p8, %p1117_p5 }
 0x1e6   : > { %v798_v32 = vpop.eup %797  ;;  %p968_p10 = por %p967_p7, %p966_p6 }
 0x1e7   : > { %v468_v33 = vmul.f32 %v798_v32, %v464_v31  ;;  %p964_p13 = pneg %p963_p4 }
 0x1e9   : > { %v469_v34 = vadd.f32 %v468_v33, %v1239_v8  ;;  %p969_p2 = pnand %p968_p10, %p964_p13 }
 0x1eb   : > { %470 = vst.msk [vmem:[%s380_s28] sm:$0xff] %vm404_vm0, %v469_v34 }
 0x1ec   : > { %972 = shalt.err (!%p969_p2)
}
 0x1ed   : > { %723 = dma.vmem_to_hbm [thread:$0]  (%p1117_p5), %s497_s22, 128, %s499_s17, %s474_s1  }
 0x1ee PF: > { %s538_s21 = sand.u32 1, %s1011_s29   ;;  %p1358_p3 = scmp.ge.s32.totalorder %s1023_s10, 2 }
 0x1ef   : > { %s539_s26 = scalar_lea.sflag [#allocation5], %s538_s21 }
 0x1f0   : > { %p741_p11 = pnand %p1358_p3, %p1131_p9 }
 0x1f2   : > { %p742_p12 = pneg %p741_p11 }
 0x1f4   : > { %1002 = dma.done.wait (%p742_p12), %s539_s26, 128  }
 0x1f5   : > { %1004 = vsyncadd (%p742_p12), %s539_s26, 4294967168  ;;  %s1359_s25 = sadd.s32 4294967294, %s1023_s10  }
 0x1f6   : > { %s548_s23 = sand.u32 1, %s1359_s25  }
 0x1f7   : > { %s549_s11 = scalar_lea.sflag [#allocation11], %s548_s23 }
 0x1f8   : > { %1006 = dma.done.wait (%p742_p12), %s549_s11, 256  }
 0x1f9   : > { %1008 = vsyncadd (%p742_p12), %s549_s11, 4294967040  ;;  %s1360_s10 = sld [smem:[#allocation19_spill]]  ;;  %s1363_s29 = smov %s1015_s30 }
 0x1fa   : > { %s1361_s16 = sld [smem:[#allocation18_spill]] }
 0x1fb   : > { %s1362_s9 = sld [smem:[#allocation20_spill]] }
 0x1ff   : > { %p27_p5 = scmp.ge.s32.totalorder %s1360_s10, 4  }
 0x200   : > { %s1364_s30 = smov %s1361_s16 }
 0x201   :  { %29 = sbr.rel (!%p27_p5) target bundleno = 12 (0xc), region = 136 }
 0x206   :  { %565 = vsyncpa [#allocation4], 1 }
 0x207   :  { %567 = vsyncpa [#allocation4 + $0x1], 1 }
 0x208   :  { %568 = vsyncpa [#allocation7], 1 }
 0x209   :  { %569 = vsyncpa [#allocation5], 1 }
 0x20a   :  { %571 = vsyncpa [#allocation5 + $0x1], 1 }
 0x20b   :  { %572 = vsyncpa [#allocation11], 1 }
 0x20c   :  { %574 = vsyncpa [#allocation11 + $0x1], 1 }

</bundles_post_ra>
